<compile_context>
chip_gen: v7x
topology: tpu7x:2x2x1
jax: 0.10.0
libtpu: 0.0.40
codegen_flags: <defaults>
</compile_context>

<pallas_src>
import functools

import numpy as np
import jax
import jax.numpy as jnp
from jax.experimental import pallas as pl
from jax.experimental.pallas import tpu as pltpu

N_IN = 8                    # (x1..x4, y1..y4)
HIDDEN = 128
N_OUT = 2
NUM_LAYERS = 6              # 6 linear layers: n_in -> 128 x 4 -> 2
NUM_MID = NUM_LAYERS - 2    # layers 1..4 stacked as [4, 128, 128] (bf16)
MAX_BLOCK_ROWS = 512        # batch-tile cap


def _round_up(x, m):
    return (x + m - 1) // m * m


def _choose_block_rows(B):
    """Batch tile: big enough to amortize per-step overhead, but >= 2 tiles
    (when the batch allows it) so v7x's two TensorCores both get work."""
    Bp = _round_up(max(B, 1), 8)
    if Bp <= 16:
        return Bp
    return min(MAX_BLOCK_ROWS, _round_up(pl.cdiv(Bp, 2), 8))


def _use_bf16_activations():
    """bf16 SiLU only where the VPU/EUP have bf16 paths (v6e / v7x)."""
    try:
        kind = jax.devices()[0].device_kind.lower()
    except Exception:
        return False
    return ("v6" in kind) or ("v7" in kind) or ("tpu7" in kind)


def _silu(h, bf16_act):
    if bf16_act:
        hb = h.astype(jnp.bfloat16)
        return hb * jax.nn.sigmoid(hb)      # stays bf16 -> feeds next dot directly
    return h * jax.nn.sigmoid(h)


def segment_mlp_kernel(x_ref, w0_ref, b0_ref, w_ref, b_ref, wl_ref, bl_ref,
                       out_ref, *, bf16_act):
    """One batch tile of the 6-layer MLP + (mu, var) head.

    x_ref : [BM, N_IN]                 f32
    w0_ref: [N_IN, HIDDEN]             f32   (layer 0, un-padded, f32 on purpose)
    b0_ref: [1, HIDDEN]                f32
    w_ref : [NUM_MID, HIDDEN, HIDDEN]  bf16  (layers 1..4)
    b_ref : [NUM_MID, 1, HIDDEN]       f32
    wl_ref: [HIDDEN, N_OUT]            f32   (final layer, kept f32 for head precision)
    bl_ref: [1, N_OUT]                 f32
    out_ref: [BM, N_OUT]               f32   (col 0 = mu, col 1 = var)
    """
    # Layer 0 (n_in -> 128): pure f32 (tiny K, avoids sub-tile bf16 operand).
    h = jnp.dot(x_ref[...], w0_ref[...],
                preferred_element_type=jnp.float32) + b0_ref[...]
    h = _silu(h, bf16_act)

    # Layers 1..4 (128 -> 128), statically unrolled, bf16 MXU / f32 accumulate.
    for l in range(NUM_MID):
        h = jnp.dot(h.astype(jnp.bfloat16), w_ref[l],
                    preferred_element_type=jnp.float32) + b_ref[l]
        h = _silu(h, bf16_act)

    # Final layer (128 -> 2) in f32; no activation.
    y = jnp.dot(h.astype(jnp.float32), wl_ref[...],
                preferred_element_type=jnp.float32) + bl_ref[...]

    # Head.  Zero-padded batch rows also flow through exp(); values are bounded
    # and sliced off in the wrapper, so this is benign.
    mu = (y[:, 0:1] - 1.0) / 100.0
    var = jnp.exp(2.0 * y[:, 1:2])
    out_ref[...] = jnp.concatenate([mu, var], axis=1)


def segment_estimator_forward_batched(x, params, *, bf16_act=None):
    """x: [B, N_IN] float32 -> (mu[B], var[B]) float32."""
    if bf16_act is None:
        bf16_act = _use_bf16_activations()
    w0, b0, w_mid, b_mid, wl, bl = params

    B = x.shape[0]
    BM = _choose_block_rows(B)
    B_pad = _round_up(B, BM)
    x = x.astype(jnp.float32)
    if B_pad != B:
        x = jnp.pad(x, ((0, B_pad - B), (0, 0)))
    nb = B_pad // BM

    out = pl.pallas_call(
        functools.partial(segment_mlp_kernel, bf16_act=bf16_act),
        out_shape=jax.ShapeDtypeStruct((B_pad, N_OUT), jnp.float32),
        grid=(nb,),
        in_specs=[
            pl.BlockSpec((BM, N_IN), lambda i: (i, 0)),
            pl.BlockSpec((N_IN, HIDDEN), lambda i: (0, 0)),
            pl.BlockSpec((1, HIDDEN), lambda i: (0, 0)),
            pl.BlockSpec((NUM_MID, HIDDEN, HIDDEN), lambda i: (0, 0, 0)),
            pl.BlockSpec((NUM_MID, 1, HIDDEN), lambda i: (0, 0, 0)),
            pl.BlockSpec((HIDDEN, N_OUT), lambda i: (0, 0)),
            pl.BlockSpec((1, N_OUT), lambda i: (0, 0)),
        ],
        out_specs=pl.BlockSpec((BM, N_OUT), lambda i: (i, 0)),
        compiler_params=pltpu.CompilerParams(
            # Batch tiles are independent -> megacore split on v7x.
            dimension_semantics=("parallel",)),
    )(x, w0, b0, w_mid, b_mid, wl, bl)

    return out[:B, 0], out[:B, 1]


def segment_estimator_forward(x, params):
    """Single-sample forward matching SegmentEstimatorBase.forward:
    x: [N_IN] -> (mu, var) scalars.  (Launch/weight-DMA bound; batch if possible.)"""
    mu, var = segment_estimator_forward_batched(x[None, :], params)
    return mu[0], var[0]


def init_params(key):
    """Deterministic synthetic MLP parameters.

    w0 / b0 / final layer in f32; mid 128x128 layers in bf16 (MXU inputs)."""
    dims = [N_IN] + [HIDDEN] * (NUM_LAYERS - 1) + [N_OUT]
    keys = jax.random.split(key, 2 * NUM_LAYERS)

    def lin(kw, kb, fi, fo):
        w = jax.random.normal(kw, (fi, fo), jnp.float32) / jnp.sqrt(jnp.float32(fi))
        b = jax.random.normal(kb, (fo,), jnp.float32) * 0.01
        return w, b

    w0, b0 = lin(keys[0], keys[1], dims[0], dims[1])
    w_mid, b_mid = [], []
    for l in range(1, NUM_LAYERS - 1):
        w, b = lin(keys[2 * l], keys[2 * l + 1], dims[l], dims[l + 1])
        w_mid.append(w)
        b_mid.append(b.reshape(1, HIDDEN))
    wl, bl = lin(keys[2 * (NUM_LAYERS - 1)], keys[2 * (NUM_LAYERS - 1) + 1],
                 dims[-2], dims[-1])

    return (w0.astype(jnp.float32),
            b0.reshape(1, HIDDEN).astype(jnp.float32),
            jnp.stack(w_mid).astype(jnp.bfloat16),
            jnp.stack(b_mid).astype(jnp.float32),
            wl.astype(jnp.float32),
            bl.reshape(1, N_OUT).astype(jnp.float32))


def reference_forward_batched(x, params, *, bf16_act):
    """Plain-JAX reference with identical numerics to the kernel."""
    w0, b0, w_mid, b_mid, wl, bl = params
    h = jnp.dot(x.astype(jnp.float32), w0,
                preferred_element_type=jnp.float32) + b0
    h = _silu(h, bf16_act)
    for l in range(NUM_MID):
        h = jnp.dot(h.astype(jnp.bfloat16), w_mid[l],
                    preferred_element_type=jnp.float32) + b_mid[l]
        h = _silu(h, bf16_act)
    y = jnp.dot(h.astype(jnp.float32), wl,
                preferred_element_type=jnp.float32) + bl
    mu = (y[:, 0] - 1.0) / 100.0
    var = jnp.exp(2.0 * y[:, 1])
    return mu, var


if __name__ == "__main__":
    root = jax.random.PRNGKey(0)
    k_x, k_p = jax.random.split(root)

    params = init_params(k_p)
    bf16_act = _use_bf16_activations()

    # Batched path (the main performance lever): B segments per call.
    B = 16
    xb = jax.random.normal(k_x, (B, N_IN), jnp.float32)
    mu_b, var_b = segment_estimator_forward_batched(xb, params, bf16_act=bf16_act)
    jax.block_until_ready((mu_b, var_b))

    mu_ref, var_ref = reference_forward_batched(xb, params, bf16_act=bf16_act)
    np.testing.assert_allclose(np.asarray(mu_b), np.asarray(mu_ref),
                               rtol=5e-3, atol=1e-5)
    np.testing.assert_allclose(np.asarray(var_b), np.asarray(var_ref),
                               rtol=5e-3, atol=1e-5)

    # Single-sample path matching the PyTorch module's forward signature.
    mu0, var0 = segment_estimator_forward(xb[0], params)
    jax.block_until_ready((mu0, var0))
    np.testing.assert_allclose(np.asarray(mu0), np.asarray(mu_ref[0]),
                               rtol=5e-3, atol=1e-5)
    np.testing.assert_allclose(np.asarray(var0), np.asarray(var_ref[0]),
                               rtol=5e-3, atol=1e-5)

    print("KERNEL_OK")
</pallas_src>

<mosaic_0001>
module attributes {stable_mosaic.version = 11 : i64} {
  func.func @segment_mlp_kernel(%arg0: i32, %arg1: memref<16x8xf32, #tpu.memory_space<vmem>>, %arg2: memref<8x128xf32, #tpu.memory_space<vmem>>, %arg3: memref<1x128xf32, #tpu.memory_space<vmem>>, %arg4: memref<4x128x128xbf16, #tpu.memory_space<vmem>>, %arg5: memref<4x1x128xf32, #tpu.memory_space<vmem>>, %arg6: memref<128x2xf32, #tpu.memory_space<vmem>>, %arg7: memref<1x2xf32, #tpu.memory_space<vmem>>, %arg8: memref<16x2xf32, #tpu.memory_space<vmem>>) attributes {dimension_semantics = [#tpu.dimension_semantics<parallel>], iteration_bounds = array<i64: 1>, scalar_prefetch = 0 : i64, scratch_operands = 0 : i64, tpu.core_type = #tpu.core_type<tc>, window_params = [{transform_indices = @transform_0, window_bounds = array<i64: 16, 8>}, {pipeline_mode = #tpu.pipeline_mode<synchronous>, transform_indices = @transform_1, window_bounds = array<i64: 8, 128>}, {pipeline_mode = #tpu.pipeline_mode<synchronous>, transform_indices = @transform_2, window_bounds = array<i64: 1, 128>}, {pipeline_mode = #tpu.pipeline_mode<synchronous>, transform_indices = @transform_3, window_bounds = array<i64: 4, 128, 128>}, {pipeline_mode = #tpu.pipeline_mode<synchronous>, transform_indices = @transform_4, window_bounds = array<i64: 4, 1, 128>}, {pipeline_mode = #tpu.pipeline_mode<synchronous>, transform_indices = @transform_5, window_bounds = array<i64: 128, 2>}, {pipeline_mode = #tpu.pipeline_mode<synchronous>, transform_indices = @transform_6, window_bounds = array<i64: 1, 2>}, {transform_indices = @transform_7, window_bounds = array<i64: 16, 2>}]} {
    %c0 = arith.constant 0 : index
    %c0_0 = arith.constant 0 : index
    %0 = vector.load %arg1[%c0, %c0_0] : memref<16x8xf32, #tpu.memory_space<vmem>>, vector<16x8xf32>
    %c0_1 = arith.constant 0 : index
    %c0_2 = arith.constant 0 : index
    %1 = vector.load %arg2[%c0_1, %c0_2] : memref<8x128xf32, #tpu.memory_space<vmem>>, vector<8x128xf32>
    %cst = arith.constant dense<0.000000e+00> : vector<16x128xf32>
    %2 = tpu.matmul %0, %1, %cst {dimension_numbers = #tpu.dot_dimension_numbers<[1], [0], [0], [1], [0, 0, 1, 1], [], []>} : vector<16x8xf32>, vector<8x128xf32>, vector<16x128xf32> -> vector<16x128xf32>
    %c0_3 = arith.constant 0 : index
    %c0_4 = arith.constant 0 : index
    %3 = vector.load %arg3[%c0_3, %c0_4] : memref<1x128xf32, #tpu.memory_space<vmem>>, vector<1x128xf32>
    %4 = vector.broadcast %3 : vector<1x128xf32> to vector<16x128xf32>
    %5 = arith.addf %2, %4 : vector<16x128xf32>
    %6 = arith.negf %5 : vector<16x128xf32>
    %7 = math.exp %6 : vector<16x128xf32>
    %cst_5 = arith.constant 1.000000e+00 : f32
    %8 = vector.broadcast %cst_5 : f32 to vector<16x128xf32>
    %9 = arith.addf %8, %7 : vector<16x128xf32>
    %10 = arith.divf %8, %9 : vector<16x128xf32>
    %11 = arith.mulf %5, %10 : vector<16x128xf32>
    %12 = arith.truncf %11 : vector<16x128xf32> to vector<16x128xbf16>
    %c0_6 = arith.constant 0 : index
    %c0_7 = arith.constant 0 : index
    %c0_8 = arith.constant 0 : index
    %13 = vector.load %arg4[%c0_6, %c0_7, %c0_8] : memref<4x128x128xbf16, #tpu.memory_space<vmem>>, vector<1x128x128xbf16>
    %14 = vector.shape_cast %13 : vector<1x128x128xbf16> to vector<128x128xbf16>
    %cst_9 = arith.constant dense<0.000000e+00> : vector<16x128xf32>
    %15 = tpu.matmul %12, %14, %cst_9 {dimension_numbers = #tpu.dot_dimension_numbers<[1], [0], [0], [1], [0, 0, 1, 1], [], []>} : vector<16x128xbf16>, vector<128x128xbf16>, vector<16x128xf32> -> vector<16x128xf32>
    %c0_10 = arith.constant 0 : index
    %c0_11 = arith.constant 0 : index
    %c0_12 = arith.constant 0 : index
    %16 = vector.load %arg5[%c0_10, %c0_11, %c0_12] : memref<4x1x128xf32, #tpu.memory_space<vmem>>, vector<1x1x128xf32>
    %17 = vector.shape_cast %16 : vector<1x1x128xf32> to vector<1x128xf32>
    %18 = vector.broadcast %17 : vector<1x128xf32> to vector<16x128xf32>
    %19 = arith.addf %15, %18 : vector<16x128xf32>
    %20 = arith.negf %19 : vector<16x128xf32>
    %21 = math.exp %20 : vector<16x128xf32>
    %cst_13 = arith.constant 1.000000e+00 : f32
    %22 = vector.broadcast %cst_13 : f32 to vector<16x128xf32>
    %23 = arith.addf %22, %21 : vector<16x128xf32>
    %24 = arith.divf %22, %23 : vector<16x128xf32>
    %25 = arith.mulf %19, %24 : vector<16x128xf32>
    %26 = arith.truncf %25 : vector<16x128xf32> to vector<16x128xbf16>
    %c1 = arith.constant 1 : index
    %c0_14 = arith.constant 0 : index
    %c0_15 = arith.constant 0 : index
    %27 = vector.load %arg4[%c1, %c0_14, %c0_15] : memref<4x128x128xbf16, #tpu.memory_space<vmem>>, vector<1x128x128xbf16>
    %28 = vector.shape_cast %27 : vector<1x128x128xbf16> to vector<128x128xbf16>
    %cst_16 = arith.constant dense<0.000000e+00> : vector<16x128xf32>
    %29 = tpu.matmul %26, %28, %cst_16 {dimension_numbers = #tpu.dot_dimension_numbers<[1], [0], [0], [1], [0, 0, 1, 1], [], []>} : vector<16x128xbf16>, vector<128x128xbf16>, vector<16x128xf32> -> vector<16x128xf32>
    %c1_17 = arith.constant 1 : index
    %c0_18 = arith.constant 0 : index
    %c0_19 = arith.constant 0 : index
    %30 = vector.load %arg5[%c1_17, %c0_18, %c0_19] : memref<4x1x128xf32, #tpu.memory_space<vmem>>, vector<1x1x128xf32>
    %31 = vector.shape_cast %30 : vector<1x1x128xf32> to vector<1x128xf32>
    %32 = vector.broadcast %31 : vector<1x128xf32> to vector<16x128xf32>
    %33 = arith.addf %29, %32 : vector<16x128xf32>
    %34 = arith.negf %33 : vector<16x128xf32>
    %35 = math.exp %34 : vector<16x128xf32>
    %cst_20 = arith.constant 1.000000e+00 : f32
    %36 = vector.broadcast %cst_20 : f32 to vector<16x128xf32>
    %37 = arith.addf %36, %35 : vector<16x128xf32>
    %38 = arith.divf %36, %37 : vector<16x128xf32>
    %39 = arith.mulf %33, %38 : vector<16x128xf32>
    %40 = arith.truncf %39 : vector<16x128xf32> to vector<16x128xbf16>
    %c2 = arith.constant 2 : index
    %c0_21 = arith.constant 0 : index
    %c0_22 = arith.constant 0 : index
    %41 = vector.load %arg4[%c2, %c0_21, %c0_22] : memref<4x128x128xbf16, #tpu.memory_space<vmem>>, vector<1x128x128xbf16>
    %42 = vector.shape_cast %41 : vector<1x128x128xbf16> to vector<128x128xbf16>
    %cst_23 = arith.constant dense<0.000000e+00> : vector<16x128xf32>
    %43 = tpu.matmul %40, %42, %cst_23 {dimension_numbers = #tpu.dot_dimension_numbers<[1], [0], [0], [1], [0, 0, 1, 1], [], []>} : vector<16x128xbf16>, vector<128x128xbf16>, vector<16x128xf32> -> vector<16x128xf32>
    %c2_24 = arith.constant 2 : index
    %c0_25 = arith.constant 0 : index
    %c0_26 = arith.constant 0 : index
    %44 = vector.load %arg5[%c2_24, %c0_25, %c0_26] : memref<4x1x128xf32, #tpu.memory_space<vmem>>, vector<1x1x128xf32>
    %45 = vector.shape_cast %44 : vector<1x1x128xf32> to vector<1x128xf32>
    %46 = vector.broadcast %45 : vector<1x128xf32> to vector<16x128xf32>
    %47 = arith.addf %43, %46 : vector<16x128xf32>
    %48 = arith.negf %47 : vector<16x128xf32>
    %49 = math.exp %48 : vector<16x128xf32>
    %cst_27 = arith.constant 1.000000e+00 : f32
    %50 = vector.broadcast %cst_27 : f32 to vector<16x128xf32>
    %51 = arith.addf %50, %49 : vector<16x128xf32>
    %52 = arith.divf %50, %51 : vector<16x128xf32>
    %53 = arith.mulf %47, %52 : vector<16x128xf32>
    %54 = arith.truncf %53 : vector<16x128xf32> to vector<16x128xbf16>
    %c3 = arith.constant 3 : index
    %c0_28 = arith.constant 0 : index
    %c0_29 = arith.constant 0 : index
    %55 = vector.load %arg4[%c3, %c0_28, %c0_29] : memref<4x128x128xbf16, #tpu.memory_space<vmem>>, vector<1x128x128xbf16>
    %56 = vector.shape_cast %55 : vector<1x128x128xbf16> to vector<128x128xbf16>
    %cst_30 = arith.constant dense<0.000000e+00> : vector<16x128xf32>
    %57 = tpu.matmul %54, %56, %cst_30 {dimension_numbers = #tpu.dot_dimension_numbers<[1], [0], [0], [1], [0, 0, 1, 1], [], []>} : vector<16x128xbf16>, vector<128x128xbf16>, vector<16x128xf32> -> vector<16x128xf32>
    %c3_31 = arith.constant 3 : index
    %c0_32 = arith.constant 0 : index
    %c0_33 = arith.constant 0 : index
    %58 = vector.load %arg5[%c3_31, %c0_32, %c0_33] : memref<4x1x128xf32, #tpu.memory_space<vmem>>, vector<1x1x128xf32>
    %59 = vector.shape_cast %58 : vector<1x1x128xf32> to vector<1x128xf32>
    %60 = vector.broadcast %59 : vector<1x128xf32> to vector<16x128xf32>
    %61 = arith.addf %57, %60 : vector<16x128xf32>
    %62 = arith.negf %61 : vector<16x128xf32>
    %63 = math.exp %62 : vector<16x128xf32>
    %cst_34 = arith.constant 1.000000e+00 : f32
    %64 = vector.broadcast %cst_34 : f32 to vector<16x128xf32>
    %65 = arith.addf %64, %63 : vector<16x128xf32>
    %66 = arith.divf %64, %65 : vector<16x128xf32>
    %67 = arith.mulf %61, %66 : vector<16x128xf32>
    %c0_35 = arith.constant 0 : index
    %c0_36 = arith.constant 0 : index
    %68 = vector.load %arg6[%c0_35, %c0_36] : memref<128x2xf32, #tpu.memory_space<vmem>>, vector<128x2xf32>
    %cst_37 = arith.constant dense<0.000000e+00> : vector<16x2xf32>
    %69 = tpu.matmul %67, %68, %cst_37 {dimension_numbers = #tpu.dot_dimension_numbers<[1], [0], [0], [1], [0, 0, 1, 1], [], []>} : vector<16x128xf32>, vector<128x2xf32>, vector<16x2xf32> -> vector<16x2xf32>
    %c0_38 = arith.constant 0 : index
    %c0_39 = arith.constant 0 : index
    %70 = vector.load %arg7[%c0_38, %c0_39] : memref<1x2xf32, #tpu.memory_space<vmem>>, vector<1x2xf32>
    %71 = vector.broadcast %70 : vector<1x2xf32> to vector<16x2xf32>
    %72 = arith.addf %69, %71 : vector<16x2xf32>
    %73 = vector.extract_strided_slice %72 {offsets = [0, 0], sizes = [16, 1], strides = [1, 1]} : vector<16x2xf32> to vector<16x1xf32>
    %cst_40 = arith.constant 1.000000e+00 : f32
    %74 = vector.broadcast %cst_40 : f32 to vector<16x1xf32>
    %75 = arith.subf %73, %74 : vector<16x1xf32>
    %cst_41 = arith.constant 1.000000e+02 : f32
    %76 = vector.broadcast %cst_41 : f32 to vector<16x1xf32>
    %77 = arith.divf %75, %76 : vector<16x1xf32>
    %78 = vector.extract_strided_slice %72 {offsets = [0, 1], sizes = [16, 1], strides = [1, 1]} : vector<16x2xf32> to vector<16x1xf32>
    %cst_42 = arith.constant 2.000000e+00 : f32
    %79 = vector.broadcast %cst_42 : f32 to vector<16x1xf32>
    %80 = arith.mulf %79, %78 : vector<16x1xf32>
    %81 = math.exp %80 : vector<16x1xf32>
    %82 = tpu.concatenate %77, %81 in 1 : vector<16x1xf32>, vector<16x1xf32> -> vector<16x2xf32>
    %c0_43 = arith.constant 0 : index
    %c0_44 = arith.constant 0 : index
    %83 = vector.load %arg8[%c0_43, %c0_44] : memref<16x2xf32, #tpu.memory_space<vmem>>, vector<16x2xf32>
    tpu.vector_store %arg8[%c0_43, %c0_44], %82 {strides = array<i32>} : memref<16x2xf32, #tpu.memory_space<vmem>>, vector<16x2xf32>,
    return
  }
  func.func @transform_0(%arg0: i32) -> (i32, i32) {
    %c0_i32 = arith.constant 0 : i32
    %c0_i32_0 = arith.constant 0 : i32
    return %arg0, %c0_i32 : i32, i32
  }
  func.func @transform_1(%arg0: i32) -> (i32, i32) {
    %c0_i32 = arith.constant 0 : i32
    %c0_i32_0 = arith.constant 0 : i32
    %c0_i32_1 = arith.constant 0 : i32
    return %c0_i32, %c0_i32_0 : i32, i32
  }
  func.func @transform_2(%arg0: i32) -> (i32, i32) {
    %c0_i32 = arith.constant 0 : i32
    %c0_i32_0 = arith.constant 0 : i32
    %c0_i32_1 = arith.constant 0 : i32
    return %c0_i32, %c0_i32_0 : i32, i32
  }
  func.func @transform_3(%arg0: i32) -> (i32, i32, i32) {
    %c0_i32 = arith.constant 0 : i32
    %c0_i32_0 = arith.constant 0 : i32
    %c0_i32_1 = arith.constant 0 : i32
    %c0_i32_2 = arith.constant 0 : i32
    return %c0_i32, %c0_i32_0, %c0_i32_1 : i32, i32, i32
  }
  func.func @transform_4(%arg0: i32) -> (i32, i32, i32) {
    %c0_i32 = arith.constant 0 : i32
    %c0_i32_0 = arith.constant 0 : i32
    %c0_i32_1 = arith.constant 0 : i32
    %c0_i32_2 = arith.constant 0 : i32
    return %c0_i32, %c0_i32_0, %c0_i32_1 : i32, i32, i32
  }
  func.func @transform_5(%arg0: i32) -> (i32, i32) {
    %c0_i32 = arith.constant 0 : i32
    %c0_i32_0 = arith.constant 0 : i32
    %c0_i32_1 = arith.constant 0 : i32
    return %c0_i32, %c0_i32_0 : i32, i32
  }
  func.func @transform_6(%arg0: i32) -> (i32, i32) {
    %c0_i32 = arith.constant 0 : i32
    %c0_i32_0 = arith.constant 0 : i32
    %c0_i32_1 = arith.constant 0 : i32
    return %c0_i32, %c0_i32_0 : i32, i32
  }
  func.func @transform_7(%arg0: i32) -> (i32, i32) {
    %c0_i32 = arith.constant 0 : i32
    %c0_i32_0 = arith.constant 0 : i32
    return %arg0, %c0_i32 : i32, i32
  }
}

</mosaic_0001>

<bundles_post_ra>
// kernel: tpu_custom_call.1
= control target key start
LH: loop header
LB: loop body
LE: loop exit
PB: predicated region body
PF: predicated region fallthrough
CT: control target
= control target key end

     0   :  { %12 = vsyncpa [#allocation3], 0  ;;  %s1150_s24 = smov [#allocation2]   ;;  %s1328_s0 = inlined_call_operand.vmem [shape: f32[16,8], index: 0, kind: input, shape index: {}]   ;;  %s1329_s1 = inlined_call_operand.vmem [shape: f32[8,128], index: 1, kind: input, shape index: {}]   ;;  %s1330_s2 = inlined_call_operand.vmem [shape: f32[1,128], index: 2, kind: input, shape index: {}]   ;;  %s1331_s3 = inlined_call_operand.hbm [shape: bf16[4,128,128], index: 3, kind: input, shape index: {}]   ;;  %s1332_s4 = inlined_call_operand.vmem [shape: f32[4,1,128], index: 4, kind: input, shape index: {}]   ;;  %s1333_s5 = inlined_call_operand.vmem [shape: f32[128,2], index: 5, kind: input, shape index: {}]   ;;  %s1334_s6 = inlined_call_operand.vmem [shape: f32[1,2], index: 6, kind: input, shape index: {}]   ;;  %s1335_s7 = inlined_call_operand.vmem [shape: f32[16,2], index: 7, kind: output, shape index: {}]  }
   0x1   :  { %s24_s25 = sshll.u32 %s1150_s24, 4  ;;  %s1126_s28 = scalar_lea.hbm %s1331_s3, 4096  ;;  %s25_s25 = int_to_ptr.vmem [resolvable:$true] %s24_s25 }
   0x2   :  { %p1127_p0 = scmp.ne.s32.totalorder %s1331_s3, %s1126_s28  ;;  %p1130_p1 = scmp.lt.u32.totalorder %s1126_s28, %s1331_s3 }
   0x4   :  { %p1132_p2 = pnand %p1130_p1, %p1127_p0 }
   0x6   :  { %1135 = shalt.err (!%p1132_p2)
}
   0x7   :  { %s1136_s10 = scalar_lea.vmem %s25_s25, 4096  ;;  %p1141_p4 = scmp.lt.s32.totalorder %s25_s25, %s25_s25 }
   0x8   :  { %p1137_p3 = scmp.ne.s32.totalorder %s25_s25, %s1136_s10  ;;  %p1142_p5 = scmp.lt.s32.totalorder %s1136_s10, %s1136_s10 }
   0xa   :  { %p1143_p6 = por %p1142_p5, %p1141_p4 }
   0xc   :  { %p1144_p7 = pnand %p1143_p6, %p1137_p3 }
   0xe   :  { %1147 = shalt.err (!%p1144_p7)
}
   0xf   :  { %s1151_s11 = smov 64   ;;  %s1152_s12 = smov 4  }
  0x10   :  { %30 = dma.hbm_to_vmem [thread:$0]  %s1331_s3, 4096, %s25_s25, [#allocation3], %s1151_s11, %s1151_s11, %s1152_s12  }
  0x11   :  { %1148 = dma.done.wait [#allocation3], 4096  }
  0x12   :  { %1149 = vsyncadd [#allocation3], 4294963200  ;;  %vm51_vm0 = vcmask 64512   ;;  %v43_v0 = vld [vmem:[%s1329_s1] sm:$0xff]  ;;  %v42_v2 = vld [vmem:[%s1328_s0 + $0x8] sm:$0xff]  ;;  %v1153_v4 = vmov 0.0  }
  0x13   :  { %v41_v1 = vld [vmem:[%s1328_s0] sm:$0xff]  ;;  %893 = vmatprep.subr.mxu0 %v43_v0  ;;  %898 = vmatprep.subr.bf16.mxu1 %v1153_v4  ;;  %v1051_v5 = vld [vmem:[#allocation2 + $0x8] sm:$0xff]   ;;  %v1052_v6 = vld [vmem:[#allocation2 + $0x10] sm:$0xff]   ;;  %vm1154_vm1 = vmmov 0   ;;  %vm770_vm2 = vcmask 7168   ;;  %vm773_vm3 = vcmask 15360  }
  0x14   :  { %895 = vmatprep.mubr.msk.f32.mxu0 %vm51_vm0, %v41_v1  ;;  %894 = vmatpush3.msra.mxu0 %v43_v0  ;;  %v1050_v3 = vld [vmem:[#allocation2] sm:$0xff]   ;;  %v1053_v7 = vld [vmem:[#allocation2 + $0x18] sm:$0xff]   ;;  %v1055_v9 = vld [vmem:[#allocation2 + $0x28] sm:$0xff]  }
  0x15   :  { %896 = vmatmul.mubr.msk.f32.vlgmr.msra.gmra.mrb[0].mxu0 %vm51_vm0, %v42_v2  ;;  %918 = vmatprep.subr.bf16.mxu0 %v1153_v4  ;;  %v1054_v8 = vld [vmem:[#allocation2 + $0x20] sm:$0xff]   ;;  %v1056_v10 = vld [vmem:[#allocation2 + $0x30] sm:$0xff]   ;;  %v1057_v11 = vld [vmem:[#allocation2 + $0x38] sm:$0xff]  }
  0x16   :  { %899 = vmatpush3.bf16.msra.mxu1 %v1050_v3  ;;  %914 = vmatprep.mubr.msk.bf16.mxu1 %vm1154_vm1, %v1153_v4  ;;  %v781_v12 = vld [vmem:[%s1330_s2] ss:$0 sm:$0xff]  ;;  %v1059_v29 = vld [vmem:[#allocation2 + $0x48] sm:$0xff]   ;;  %v1060_v30 = vld [vmem:[#allocation2 + $0x50] sm:$0xff]  }
  0x17   :  { %900 = vmatprep.subr.bf16.mxu1 %v1153_v4  ;;  %934 = vmatprep.mubr.msk.bf16.mxu0 %vm1154_vm1, %v1153_v4  ;;  %v1058_v28 = vld [vmem:[#allocation2 + $0x40] sm:$0xff]   ;;  %v1061_v31 = vld [vmem:[#allocation2 + $0x58] sm:$0xff]   ;;  %v1063_v33 = vld [vmem:[#allocation2 + $0x68] sm:$0xff]  }
  0x18   :  { %919 = vmatpush3.bf16.msra.mxu0 %v1058_v28  ;;  %v1062_v32 = vld [vmem:[#allocation2 + $0x60] sm:$0xff]   ;;  %v1064_v34 = vld [vmem:[#allocation2 + $0x70] sm:$0xff]   ;;  %v1065_v35 = vld [vmem:[#allocation2 + $0x78] sm:$0xff]  }
  0x19   :  { %920 = vmatprep.subr.bf16.mxu0 %v1153_v4  ;;  %v786_v36 = vld [vmem:[%s1332_s4] ss:$0 sm:$0xff]  ;;  %v1067_v55 = vld [vmem:[#allocation2 + $0x88] sm:$0xff]   ;;  %v1068_v56 = vld [vmem:[#allocation2 + $0x90] sm:$0xff]  }
  0x1a   :  { %901 = vmatpush3.bf16.msra.mxu1 %v1051_v5  ;;  %v1066_v54 = vld [vmem:[#allocation2 + $0x80] sm:$0xff]   ;;  %v1069_v57 = vld [vmem:[#allocation2 + $0x98] sm:$0xff]   ;;  %v1071_v59 = vld [vmem:[#allocation2 + $0xa8] sm:$0xff]  }
  0x1b   :  { %902 = vmatprep.subr.bf16.mxu1 %v1153_v4  ;;  %v1070_v58 = vld [vmem:[#allocation2 + $0xa0] sm:$0xff]   ;;  %v1072_v60 = vld [vmem:[#allocation2 + $0xb0] sm:$0xff]   ;;  %v1073_v61 = vld [vmem:[#allocation2 + $0xb8] sm:$0xff]  }
  0x1c   :  { %921 = vmatpush3.bf16.msra.mxu0 %v1059_v29  ;;  %v798_v62 = vld [vmem:[%s1332_s4 + $0x1] ss:$0 sm:$0xff] }
  0x1d   :  { %922 = vmatprep.subr.bf16.mxu0 %v1153_v4 }
  0x1e   :  { %903 = vmatpush3.bf16.msra.mxu1 %v1052_v6 }
  0x1f   :  { %904 = vmatprep.subr.bf16.mxu1 %v1153_v4 }
  0x20   :  { %923 = vmatpush3.bf16.msra.mxu0 %v1060_v30 }
  0x21   :  { %924 = vmatprep.subr.bf16.mxu0 %v1153_v4 }
  0x22   :  { %905 = vmatpush3.bf16.msra.mxu1 %v1053_v7 }
  0x23   :  { %906 = vmatprep.subr.bf16.mxu1 %v1153_v4 }
  0x24   :  { %925 = vmatpush3.bf16.msra.mxu0 %v1061_v31 }
  0x25   :  { %926 = vmatprep.subr.bf16.mxu0 %v1153_v4 }
  0x26   :  { %907 = vmatpush3.bf16.msra.mxu1 %v1054_v8 }
  0x27   :  { %908 = vmatprep.subr.bf16.mxu1 %v1153_v4 }
  0x28   :  { %927 = vmatpush3.bf16.msra.mxu0 %v1062_v32 }
  0x29   :  { %928 = vmatprep.subr.bf16.mxu0 %v1153_v4 }
  0x2a   :  { %909 = vmatpush3.bf16.msra.mxu1 %v1055_v9 }
  0x2b   :  { %910 = vmatprep.subr.bf16.mxu1 %v1153_v4 }
  0x2c   :  { %929 = vmatpush3.bf16.msra.mxu0 %v1063_v33 }
  0x2d   :  { %930 = vmatprep.subr.bf16.mxu0 %v1153_v4 }
  0x2e   :  { %911 = vmatpush3.bf16.msra.mxu1 %v1056_v10 }
  0x2f   :  { %912 = vmatprep.subr.bf16.mxu1 %v1153_v4 }
  0x30   :  { %931 = vmatpush3.bf16.msra.mxu0 %v1064_v34 }
  0x31   :  { %932 = vmatprep.subr.bf16.mxu0 %v1153_v4 }
  0x32   :  { %913 = vmatpush3.bf16.msra.mxu1 %v1057_v11 }
  0x33   :  { %938 = vmatprep.subr.bf16.mxu1 %v1153_v4 }
  0x34   :  { %933 = vmatpush3.bf16.msra.mxu0 %v1065_v35 }
  0x35   :  { %958 = vmatprep.subr.bf16.mxu0 %v1153_v4 }
  0xe8   :  { %v897_v13 = vpop.f32.mrb[0].mxu0 }
  0xe9   :  { %v130_v14 = vadd.f32 %v897_v13, %v781_v12  ;;  %v124_v15 = vpop.f32.mrb[1].mxu0 }
  0xea   :  { %v125_v16 = vadd.f32 %v781_v12, %v124_v15 }
  0xeb   :  { %v785_v17 = vmul.f32 -1.442695, %v130_v14 }
  0xec   :  { %v784_v18 = vmul.f32 -1.442695, %v125_v16 }
  0xed   :  { %1082 = vpow2.f32 %v785_v17  ;;  %v1074_v17 = vld [vmem:[#allocation2 + $0xc0] sm:$0xff]  }
  0xee   :  { %1084 = vpow2.f32 %v784_v18  ;;  %v1075_v18 = vld [vmem:[#allocation2 + $0xc8] sm:$0xff]  }
  0xf7   :  { %v1083_v19 = vpop.eup %1082 }
  0xf8   :  { %v1085_v20 = vpop.eup %1084  ;;  %v140_v21 = vadd.f32 1.0, %v1083_v19  ;;  %v1076_v19 = vld [vmem:[#allocation2 + $0xd0] sm:$0xff]  }
  0xf9   :  { %v139_v22 = vadd.f32 1.0, %v1085_v20  ;;  %v1077_v20 = vld [vmem:[#allocation2 + $0xd8] sm:$0xff]  }
  0xfa   :  { %1086 = vrcp.f32 %v140_v21  ;;  %v1078_v21 = vld [vmem:[#allocation2 + $0xe0] sm:$0xff]  }
  0xfb   :  { %1088 = vrcp.f32 %v139_v22  ;;  %v1079_v22 = vld [vmem:[#allocation2 + $0xe8] sm:$0xff]  }
 0x104   :  { %v1087_v23 = vpop.eup %1086 }
 0x105   :  { %v1089_v24 = vpop.eup %1088  ;;  %v146_v25 = vmul.f32 %v1087_v23, %v130_v14  ;;  %v1080_v23 = vld [vmem:[#allocation2 + $0xf0] sm:$0xff]  }
 0x106   :  { %v145_v26 = vmul.f32 %v1089_v24, %v125_v16  ;;  %v1081_v24 = vld [vmem:[#allocation2 + $0xf8] sm:$0xff]  }
 0x108   :  { %v147_v27 = vpack.c.bf16 %v146_v25, %v145_v26  ;;  %v810_v25 = vld [vmem:[%s1332_s4 + $0x2] ss:$0 sm:$0xff] }
 0x10a   :  { %915 = vmatmul.mubr.bf16.vlgmr.msra.gmra.mrb[0].mxu1 %v147_v27 }
 0x10b   :  { %954 = vmatprep.mubr.msk.bf16.mxu1 %vm1154_vm1, %v1153_v4  ;;  %939 = vmatpush3.bf16.msra.mxu1 %v1066_v54  ;;  %v669_v54 = vld [vmem:[%s1333_s5 + $0x40] sm:$0xff] }
 0x10c   :  { %940 = vmatprep.subr.bf16.mxu1 %v1153_v4 }
 0x10f   :  { %941 = vmatpush3.bf16.msra.mxu1 %v1067_v55  ;;  %v670_v55 = vld [vmem:[%s1333_s5 + $0x48] sm:$0xff] }
 0x110   :  { %942 = vmatprep.subr.bf16.mxu1 %v1153_v4 }
 0x113   :  { %943 = vmatpush3.bf16.msra.mxu1 %v1068_v56  ;;  %v1029_v56 = vpack.c.bf16 %v670_v55, %v669_v54 }
 0x114   :  { %944 = vmatprep.subr.bf16.mxu1 %v1153_v4 }
 0x117   :  { %945 = vmatpush3.bf16.msra.mxu1 %v1069_v57  ;;  %v671_v57 = vld [vmem:[%s1333_s5 + $0x50] sm:$0xff] }
 0x118   :  { %946 = vmatprep.subr.bf16.mxu1 %v1153_v4 }
 0x11b   :  { %947 = vmatpush3.bf16.msra.mxu1 %v1070_v58  ;;  %v672_v58 = vld [vmem:[%s1333_s5 + $0x58] sm:$0xff] }
 0x11c   :  { %948 = vmatprep.subr.bf16.mxu1 %v1153_v4 }
 0x11f   :  { %949 = vmatpush3.bf16.msra.mxu1 %v1071_v59  ;;  %v1033_v59 = vpack.c.bf16 %v672_v58, %v671_v57 }
 0x120   :  { %950 = vmatprep.subr.bf16.mxu1 %v1153_v4 }
 0x123   :  { %951 = vmatpush3.bf16.msra.mxu1 %v1072_v60  ;;  %v673_v60 = vld [vmem:[%s1333_s5 + $0x60] sm:$0xff] }
 0x124   :  { %952 = vmatprep.subr.bf16.mxu1 %v1153_v4 }
 0x127   :  { %953 = vmatpush3.bf16.msra.mxu1 %v1073_v61  ;;  %v674_v61 = vld [vmem:[%s1333_s5 + $0x68] sm:$0xff] }
 0x1dd   :  { %v253_v37 = vpop.f32.mrb[0].mxu1 }
 0x1de   :  { %v254_v38 = vadd.f32 %v786_v36, %v253_v37  ;;  %v916_v39 = vpop.f32.mrb[1].mxu1 }
 0x1df   :  { %v256_v40 = vpop.f32.mrb[2].mxu1 }
 0x1e0   :  { %v795_v41 = vmul.f32 -1.442695, %v254_v38  ;;  %v257_v42 = vadd.f32 %v786_v36, %v256_v40  ;;  %v917_v43 = vpop.f32.mrb[3].mxu1 }
 0x1e1   :  { %v662_v43 = vld [vmem:[%s1333_s5 + $0x8] sm:$0xff] }
 0x1e2   :  { %1090 = vpow2.f32 %v795_v41  ;;  %v796_v44 = vmul.f32 -1.442695, %v257_v42 }
 0x1e4   :  { %1092 = vpow2.f32 %v796_v44 }
 0x1ec   :  { %v1091_v45 = vpop.eup %1090 }
 0x1ed   :  { %v266_v46 = vadd.f32 1.0, %v1091_v45  ;;  %v663_v45 = vld [vmem:[%s1333_s5 + $0x10] sm:$0xff] }
 0x1ee   :  { %v1093_v47 = vpop.eup %1092 }
 0x1ef   :  { %1094 = vrcp.f32 %v266_v46  ;;  %v267_v48 = vadd.f32 1.0, %v1093_v47  ;;  %v664_v46 = vld [vmem:[%s1333_s5 + $0x18] sm:$0xff] }
 0x1f0   :  { %v1017_v47 = vpack.c.bf16 %v664_v46, %v663_v45 }
 0x1f1   :  { %1096 = vrcp.f32 %v267_v48  ;;  %v665_v48 = vld [vmem:[%s1333_s5 + $0x20] sm:$0xff] }
 0x1f9   :  { %v1095_v49 = vpop.eup %1094 }
 0x1fa   :  { %v272_v51 = vmul.f32 %v1095_v49, %v254_v38  ;;  %v666_v49 = vld [vmem:[%s1333_s5 + $0x28] sm:$0xff] }
 0x1fb   :  { %v1097_v50 = vpop.eup %1096 }
 0x1fc   :  { %v273_v52 = vmul.f32 %v1097_v50, %v257_v42  ;;  %v661_v42 = vld [vmem:[%s1333_s5] sm:$0xff]  ;;  %v1021_v50 = vpack.c.bf16 %v666_v49, %v665_v48 }
 0x1fd   :  { %v1013_v44 = vpack.c.bf16 %v662_v43, %v661_v42 }
 0x1fe   :  { %v274_v53 = vpack.c.bf16 %v273_v52, %v272_v51  ;;  %v667_v51 = vld [vmem:[%s1333_s5 + $0x30] sm:$0xff]  ;;  %v668_v52 = vld [vmem:[%s1333_s5 + $0x38] sm:$0xff] }
 0x1ff   :  { %1014 = vmatprep.subr.bf16.mxu1 %v1013_v44 }
 0x200   :  { %935 = vmatmul.mubr.bf16.vlgmr.msra.gmra.mrb[4].mxu0 %v274_v53  ;;  %v1025_v53 = vpack.c.bf16 %v668_v52, %v667_v51 }
 0x201   :  { %974 = vmatprep.mubr.msk.bf16.mxu0 %vm1154_vm1, %v1153_v4  ;;  %959 = vmatpush3.bf16.msra.mxu0 %v1074_v17 }
 0x202   :  { %960 = vmatprep.subr.bf16.mxu0 %v1153_v4 }
 0x205   :  { %961 = vmatpush3.bf16.msra.mxu0 %v1075_v18 }
 0x206   :  { %962 = vmatprep.subr.bf16.mxu0 %v1153_v4 }
 0x209   :  { %963 = vmatpush3.bf16.msra.mxu0 %v1076_v19 }
 0x20a   :  { %964 = vmatprep.subr.bf16.mxu0 %v1153_v4 }
 0x20d   :  { %965 = vmatpush3.bf16.msra.mxu0 %v1077_v20  ;;  %v833_v20 = vld [vmem:[%s1334_s6] ss:$0 sm:$0xff] }
 0x20e   :  { %966 = vmatprep.subr.bf16.mxu0 %v1153_v4 }
 0x211   :  { %967 = vmatpush3.bf16.msra.mxu0 %v1078_v21 }
 0x212   :  { %968 = vmatprep.subr.bf16.mxu0 %v1153_v4 }
 0x215   :  { %969 = vmatpush3.bf16.msra.mxu0 %v1079_v22 }
 0x216   :  { %970 = vmatprep.subr.bf16.mxu0 %v1153_v4 }
 0x219   :  { %971 = vmatpush3.bf16.msra.mxu0 %v1080_v23 }
 0x21a   :  { %972 = vmatprep.subr.bf16.mxu0 %v1153_v4 }
 0x21d   :  { %973 = vmatpush3.bf16.msra.mxu0 %v1081_v24 }
 0x2d3   :  { %v382_v63 = vpop.f32.mrb[4].mxu0 }
 0x2d4   :  { %v383_v0 = vadd.f32 %v798_v62, %v382_v63  ;;  %v936_v1 = vpop.f32.mrb[5].mxu0  ;;  %v675_v63 = vld [vmem:[%s1333_s5 + $0x70] sm:$0xff] }
 0x2d5   :  { %v385_v2 = vpop.f32.mrb[6].mxu0 }
 0x2d6   :  { %v807_v3 = vmul.f32 -1.442695, %v383_v0  ;;  %v386_v5 = vadd.f32 %v798_v62, %v385_v2  ;;  %v937_v6 = vpop.f32.mrb[7].mxu0  ;;  %v1037_v62 = vpack.c.bf16 %v674_v61, %v673_v60  ;;  %v822_v2 = vld [vmem:[%s1332_s4 + $0x3] ss:$0 sm:$0xff] }
 0x2d8   :  { %1098 = vpow2.f32 %v807_v3  ;;  %v808_v7 = vmul.f32 -1.442695, %v386_v5 }
 0x2da   :  { %1100 = vpow2.f32 %v808_v7 }
 0x2e2   :  { %v1099_v8 = vpop.eup %1098 }
 0x2e3   :  { %v395_v9 = vadd.f32 1.0, %v1099_v8 }
 0x2e4   :  { %v1101_v10 = vpop.eup %1100 }
 0x2e5   :  { %1102 = vrcp.f32 %v395_v9  ;;  %v396_v11 = vadd.f32 1.0, %v1101_v10 }
 0x2e7   :  { %1104 = vrcp.f32 %v396_v11 }
 0x2ef   :  { %v1103_v12 = vpop.eup %1102 }
 0x2f0   :  { %v401_v14 = vmul.f32 %v1103_v12, %v383_v0  ;;  %v676_v0 = vld [vmem:[%s1333_s5 + $0x78] sm:$0xff] }
 0x2f1   :  { %v1105_v13 = vpop.eup %1104  ;;  %v1041_v1 = vpack.c.bf16 %v676_v0, %v675_v63 }
 0x2f2   :  { %v402_v15 = vmul.f32 %v1105_v13, %v386_v5 }
 0x2f4   :  { %v403_v16 = vpack.c.bf16 %v402_v15, %v401_v14 }
 0x2f6   :  { %955 = vmatmul.mubr.bf16.vlgmr.msra.gmra.mrb[4].mxu1 %v403_v16 }
 0x2f7   :  { %1016 = vmatpush3.bf16.msra.mxu1 %v1013_v44 }
 0x2f8   :  { %1018 = vmatprep.subr.bf16.mxu1 %v1017_v47 }
 0x2fb   :  { %1020 = vmatpush3.bf16.msra.mxu1 %v1017_v47 }
 0x2fc   :  { %1022 = vmatprep.subr.bf16.mxu1 %v1021_v50 }
 0x2ff   :  { %1024 = vmatpush3.bf16.msra.mxu1 %v1021_v50 }
 0x300   :  { %1026 = vmatprep.subr.bf16.mxu1 %v1025_v53 }
 0x303   :  { %1028 = vmatpush3.bf16.msra.mxu1 %v1025_v53 }
 0x304   :  { %1030 = vmatprep.subr.bf16.mxu1 %v1029_v56 }
 0x307   :  { %1032 = vmatpush3.bf16.msra.mxu1 %v1029_v56 }
 0x308   :  { %1034 = vmatprep.subr.bf16.mxu1 %v1033_v59 }
 0x30b   :  { %1036 = vmatpush3.bf16.msra.mxu1 %v1033_v59 }
 0x30c   :  { %1038 = vmatprep.subr.bf16.mxu1 %v1037_v62 }
 0x30f   :  { %1040 = vmatpush3.bf16.msra.mxu1 %v1037_v62 }
 0x310   :  { %1042 = vmatprep.subr.bf16.mxu1 %v1041_v1 }
 0x313   :  { %1044 = vmatpush3.bf16.msra.mxu1 %v1041_v1 }
 0x3c9   :  { %v511_v26 = vpop.f32.mrb[4].mxu1 }
 0x3ca   :  { %v512_v27 = vadd.f32 %v810_v25, %v511_v26  ;;  %v956_v28 = vpop.f32.mrb[5].mxu1 }
 0x3cb   :  { %v514_v29 = vpop.f32.mrb[6].mxu1 }
 0x3cc   :  { %v819_v30 = vmul.f32 -1.442695, %v512_v27  ;;  %v515_v31 = vadd.f32 %v810_v25, %v514_v29  ;;  %v957_v32 = vpop.f32.mrb[7].mxu1 }
 0x3ce   :  { %1106 = vpow2.f32 %v819_v30  ;;  %v820_v33 = vmul.f32 -1.442695, %v515_v31 }
 0x3d0   :  { %1108 = vpow2.f32 %v820_v33 }
 0x3d8   :  { %v1107_v34 = vpop.eup %1106 }
 0x3d9   :  { %v524_v35 = vadd.f32 1.0, %v1107_v34 }
 0x3da   :  { %v1109_v36 = vpop.eup %1108 }
 0x3db   :  { %1110 = vrcp.f32 %v524_v35  ;;  %v525_v4 = vadd.f32 1.0, %v1109_v36 }
 0x3dd   :  { %1112 = vrcp.f32 %v525_v4 }
 0x3e5   :  { %v1111_v37 = vpop.eup %1110 }
 0x3e6   :  { %v530_v39 = vmul.f32 %v1111_v37, %v512_v27 }
 0x3e7   :  { %v1113_v38 = vpop.eup %1112 }
 0x3e8   :  { %v531_v40 = vmul.f32 %v1113_v38, %v515_v31 }
 0x3ea   :  { %v532_v41 = vpack.c.bf16 %v531_v40, %v530_v39 }
 0x3ec   :  { %975 = vmatmul.mubr.bf16.vlgmr.msra.gmra.mrb[8].mxu0 %v532_v41 }
 0x4bf   :  { %v640_v3 = vpop.f32.mrb[8].mxu0 }
 0x4c0   :  { %v641_v5 = vadd.f32 %v822_v2, %v640_v3  ;;  %v976_v6 = vpop.f32.mrb[9].mxu0 }
 0x4c1   :  { %v643_v7 = vpop.f32.mrb[10].mxu0 }
 0x4c2   :  { %v831_v8 = vmul.f32 -1.442695, %v641_v5  ;;  %v644_v9 = vadd.f32 %v822_v2, %v643_v7  ;;  %v977_v10 = vpop.f32.mrb[11].mxu0 }
 0x4c4   :  { %1114 = vpow2.f32 %v831_v8  ;;  %v832_v11 = vmul.f32 -1.442695, %v644_v9 }
 0x4c6   :  { %1116 = vpow2.f32 %v832_v11 }
 0x4ce   :  { %v1115_v12 = vpop.eup %1114 }
 0x4cf   :  { %v653_v13 = vadd.f32 1.0, %v1115_v12 }
 0x4d0   :  { %v1117_v14 = vpop.eup %1116 }
 0x4d1   :  { %1118 = vrcp.f32 %v653_v13  ;;  %v654_v15 = vadd.f32 1.0, %v1117_v14 }
 0x4d3   :  { %1120 = vrcp.f32 %v654_v15 }
 0x4db   :  { %v1119_v16 = vpop.eup %1118 }
 0x4dc   :  { %v659_v17 = vmul.f32 %v1119_v16, %v641_v5 }
 0x4dd   :  { %v1121_v18 = vpop.eup %1120 }
 0x4de   :  { %v660_v19 = vmul.f32 %v1121_v18, %v644_v9  ;;  %1010 = vmatprep.mubr.f32.mxu1 %v659_v17 }
 0x4e0   :  { %1011 = vmatmul.mubr.f32.vlgmr.msra.gmra.mrb[8].mxu1 %v660_v19 }
 0x5b3   :  { %v1012_v21 = vpop.f32.mrb[8].mxu1 }
 0x5b4   :  { %v756_v22 = vadd.f32 %v1012_v21, %v833_v20  ;;  %v750_v23 = vpop.f32.mrb[9].mxu1 }
 0x5b5   :  { %v751_v24 = vadd.f32 %v833_v20, %v750_v23 }
 0x5b6   :  { %v765_v25 = vmul.f32 2.0, %v756_v22  ;;  %v835_v29 = vadd.f32 -1.0, %v756_v22 }
 0x5b7   :  { %v764_v26 = vmul.f32 2.0, %v751_v24  ;;  %v834_v30 = vadd.f32 -1.0, %v751_v24 }
 0x5b8   :  { %v768_v27 = vmul.f32 1.442695, %v765_v25  ;;  %v763_v31 = vmul.f32 0.01, %v835_v29 }
 0x5b9   :  { %v766_v28 = vmul.f32 1.442695, %v764_v26  ;;  %v762_v33 = vmul.f32 0.01, %v834_v30 }
 0x5ba   :  { %1122 = vpow2.f32 %v768_v27 }
 0x5bb   :  { %1124 = vpow2.f32 %v766_v28 }
 0x5c4   :  { %v1123_v32 = vpop.eup %1122 }
 0x5c5   :  { %v1125_v34 = vpop.eup %1124  ;;  %v772_v35 = vsel %vm770_vm2, %v763_v31, %v1123_v32 }
 0x5c6   :  { %775 = vst.msk [vmem:[%s1335_s7 + $0x8] sm:$0xff] %vm773_vm3, %v772_v35  ;;  %v771_v36 = vsel %vm770_vm2, %v762_v33, %v1125_v34 }
 0x5c7   :  { %774 = vst.msk [vmem:[%s1335_s7] sm:$0xff] %vm773_vm3, %v771_v36 }
 0x5c8   :  { %780 = vsyncpa [#allocation3], 1 }

</bundles_post_ra>
